<compile_context>
chip_gen: v7x
topology: tpu7x:2x2x1
jax: 0.10.0
libtpu: 0.0.40
codegen_flags: <defaults>
</compile_context>

<pallas_src>
import functools

import jax
import jax.numpy as jnp
from jax.experimental import pallas as pl
from jax.experimental.pallas import tpu as pltpu


def _round_up(x, m):
    return (x + m - 1) // m * m


def _vmem_capacity_bytes():
    """Physical per-core VMEM; conservative v7x fallback if the query fails."""
    try:
        return int(pltpu.get_tpu_info().vmem_capacity_bytes)
    except Exception:
        return 64 << 20


def _invariant_spec(shape, index_map):
    """Grid-invariant block: single-buffer it if this JAX supports Buffered."""
    try:
        return pl.BlockSpec(shape, index_map, pipeline_mode=pl.Buffered(1))
    except TypeError:
        return pl.BlockSpec(shape, index_map)


# ---------------------------------------------------------------------------
# Kernel
# ---------------------------------------------------------------------------
def gate_cross_kernel(x_ref, w_ref, b_ref, o_ref, *, cross_layers, split):
    # x_ref: (tb, Dp)        batch tile (f32 path)
    # w_ref: (L, Dp, 2*Dp)   fused [W^T | Wg^T] weights (bf16), VMEM-resident
    # b_ref: (L, 1, Dp)      biases (f32)
    # o_ref: (tb, Dp)
    d_pad = x_ref.shape[1]

    def layer(x0, x, w, b):
        # One MXU issue per layer: bf16 operands, f32 accumulation, N = 2*Dp.
        xy = jnp.dot(x.astype(w.dtype), w, preferred_element_type=jnp.float32)
        xw = xy[:, :d_pad]                       # cross projection
        xg = jax.nn.sigmoid(xy[:, d_pad:])       # gate (EUP)
        return x0 * (xw + b) * xg + x            # f32 elementwise path (VPU)

    if split:
        # Two independent half-tiles -> ILP: the scheduler overlaps one half's
        # MXU matmul with the other half's sigmoid/gate elementwise chain.
        h = x_ref.shape[0] // 2
        xa0 = x_ref[:h, :].astype(jnp.float32)
        xb0 = x_ref[h:, :].astype(jnp.float32)
        xa, xb = xa0, xb0
        for i in range(cross_layers):            # static unroll; L is small
            w, b = w_ref[i], b_ref[i]
            xa = layer(xa0, xa, w, b)
            xb = layer(xb0, xb, w, b)
        o_ref[:h, :] = xa.astype(o_ref.dtype)
        o_ref[h:, :] = xb.astype(o_ref.dtype)
    else:
        x0 = x_ref[...].astype(jnp.float32)
        x = x0
        for i in range(cross_layers):
            x = layer(x0, x, w_ref[i], b_ref[i])
        o_ref[...] = x.astype(o_ref.dtype)


# ---------------------------------------------------------------------------
# One-time parameter preparation (hoisted out of the per-call path)
# ---------------------------------------------------------------------------
def prepare_gate_cross_params(w_t, wg_t, b, *, mxu_dtype=jnp.bfloat16):
    """w_t, wg_t: (L, D, D) pre-transposed (y = x @ w_t[i]); b: (L, 1, D) or (L, D).

    Returns (w_fused, b_p) with feature dim padded to a lane-dense multiple of
    128 and the cross/gate weights fused into one (Dp, 2*Dp) bf16 matrix per
    layer.  Padded lanes provably stay zero through the recurrence.
    """
    L, D, _ = w_t.shape
    b = jnp.asarray(b).reshape(L, 1, D)
    Dp = _round_up(D, 128)
    if Dp == D:
        w_p, wg_p = w_t, wg_t
        b_p = b.astype(jnp.float32)
    else:
        w_p = jnp.zeros((L, Dp, Dp), w_t.dtype).at[:, :D, :D].set(w_t)
        wg_p = jnp.zeros((L, Dp, Dp), wg_t.dtype).at[:, :D, :D].set(wg_t)
        b_p = jnp.zeros((L, 1, Dp), jnp.float32).at[:, :, :D].set(b.astype(jnp.float32))
    w_fused = jnp.concatenate([w_p, wg_p], axis=-1).astype(mxu_dtype)  # (L, Dp, 2*Dp)
    return w_fused, b_p


# ---------------------------------------------------------------------------
# Per-call wrapper
# ---------------------------------------------------------------------------
def gate_cross_layer_apply(x, w_fused, b_p, *, tile_batch=512):
    """x: (B, D) activations; w_fused/b_p from prepare_gate_cross_params."""
    B, D = x.shape
    L, Dp, Dp2 = w_fused.shape
    assert Dp2 == 2 * Dp and Dp % 128 == 0 and Dp >= D

    # ---- batch tile selection -------------------------------------------
    cap_use = int(_vmem_capacity_bytes() * 0.75)  # leave headroom for Mosaic scratch

    tb = _round_up(min(tile_batch, max(16, B)), 16)
    # v7x megacore: keep the ("parallel",) batch grid >= 2 steps when possible.
    if pl.cdiv(B, tb) < 2 and B >= 32:
        tb = _round_up(pl.cdiv(B, 2), 16)

    x_itemsize = jnp.dtype(x.dtype).itemsize
    w_itemsize = jnp.dtype(w_fused.dtype).itemsize

    def _budget(tb_):
        io = 2 * 2 * tb_ * Dp * x_itemsize            # double-buffered in + out tiles
        temps = 6 * tb_ * Dp * 4                      # x0, x, xy(2*Dp) f32 temporaries
        wts = L * Dp * (2 * Dp) * w_itemsize          # single-buffered fused weights
        bias = L * Dp * 4
        return io + temps + wts + bias

    while _budget(tb) > cap_use and tb > 16:
        tb = max(16, _round_up(tb // 2, 16))

    Bp = _round_up(B, tb)
    vmem_limit = int(min(cap_use, max(32 << 20, int(1.2 * _budget(tb)) + (2 << 20))))
    split = tb >= 64  # half-tile interleaving only pays off for larger tiles

    # ---- input padding only when actually needed -------------------------
    need_pad = (Dp != D) or (Bp != B)
    if need_pad:
        # Padded lanes/rows stay exactly zero through every layer:
        # x0_pad = 0, W_pad = 0, b_pad = 0  =>  0*(0+0)*sigmoid(.) + 0 = 0.
        x_in = jnp.zeros((Bp, Dp), x.dtype).at[:B, :D].set(x)
    else:
        x_in = x

    kernel = functools.partial(gate_cross_kernel, cross_layers=L, split=split)

    out_p = pl.pallas_call(
        kernel,
        out_shape=jax.ShapeDtypeStruct((Bp, Dp), x.dtype),
        grid_spec=pltpu.PrefetchScalarGridSpec(
            num_scalar_prefetch=0,
            grid=(Bp // tb,),
            in_specs=[
                pl.BlockSpec((tb, Dp), lambda i: (i, 0)),               # x tile
                _invariant_spec((L, Dp, 2 * Dp), lambda i: (0, 0, 0)),  # fused [W^T|Wg^T]
                _invariant_spec((L, 1, Dp), lambda i: (0, 0, 0)),       # biases
            ],
            out_specs=pl.BlockSpec((tb, Dp), lambda i: (i, 0)),
        ),
        compiler_params=pltpu.CompilerParams(
            dimension_semantics=("parallel",),
            vmem_limit_bytes=vmem_limit,
        ),
    )(x_in, w_fused, b_p)

    if need_pad:
        return out_p[:B, :D]
    return out_p
    # TODO(synk): optional bf16 activation streaming / fp8 weights (v7x) are
    # further levers for the HBM-/compute-bound regimes; left off by default to
    # preserve f32 I/O semantics of the PyTorch module.


def gate_cross_layer(x, w_t, wg_t, b, *, tile_batch=512, mxu_dtype=jnp.bfloat16):
    """Convenience one-shot entry (prep + apply). Prefer prepping once."""
    w_fused, b_p = prepare_gate_cross_params(w_t, wg_t, b, mxu_dtype=mxu_dtype)
    return gate_cross_layer_apply(x, w_fused, b_p, tile_batch=tile_batch)


# ---------------------------------------------------------------------------
# Pure-JAX reference (mirrors the kernel's bf16 MXU operands)
# ---------------------------------------------------------------------------
def gate_cross_reference(x, w_t, wg_t, b, mxu_dtype=jnp.bfloat16):
    x0 = x.astype(jnp.float32)
    out = x0
    for i in range(w_t.shape[0]):
        xw = jnp.dot(out.astype(mxu_dtype), w_t[i].astype(mxu_dtype),
                     preferred_element_type=jnp.float32)
        xg = jax.nn.sigmoid(jnp.dot(out.astype(mxu_dtype), wg_t[i].astype(mxu_dtype),
                                    preferred_element_type=jnp.float32))
        out = x0 * (xw + b[i]) * xg + out
    return out


if __name__ == "__main__":
    key = jax.random.PRNGKey(0)
    input_dim, cross_layers = 32, 3

    k_x, k_w, k_wg, k_b = jax.random.split(key, 4)

    # Synthetic params matching nn.Linear(input_dim, input_dim, bias=False) per
    # layer, stored pre-transposed so y = x @ w_t[i]; b ~ U[0, 1) (nn.init.uniform_).
    bound = float(input_dim) ** -0.5
    w_t = jax.random.uniform(k_w, (cross_layers, input_dim, input_dim),
                             minval=-bound, maxval=bound, dtype=jnp.float32)
    wg_t = jax.random.uniform(k_wg, (cross_layers, input_dim, input_dim),
                              minval=-bound, maxval=bound, dtype=jnp.float32)
    b = jax.random.uniform(k_b, (cross_layers, 1, input_dim),
                           minval=0.0, maxval=1.0, dtype=jnp.float32)

    # One-time parameter prep (hoisted out of the per-call path).
    w_fused, b_p = prepare_gate_cross_params(w_t, wg_t, b)
    w_fused, b_p = jax.block_until_ready((w_fused, b_p))

    # Small single-tile case (non-split path) and a multi-tile case that
    # exercises the split / megacore path.
    for batch in (16, 160):
        x = jax.random.normal(jax.random.fold_in(k_x, batch),
                              (batch, input_dim), dtype=jnp.float32)
        out = gate_cross_layer_apply(x, w_fused, b_p)
        out = jax.block_until_ready(out)

        ref = gate_cross_reference(x, w_t, wg_t, b)
        assert out.shape == ref.shape
        assert jnp.allclose(out, ref, atol=2e-3, rtol=2e-3), \
            f"mismatch vs JAX reference (batch={batch})"

    print("KERNEL_OK")
</pallas_src>

<mosaic_0001>
module attributes {stable_mosaic.version = 11 : i64} {
  func.func @gate_cross_kernel(%arg0: i32, %arg1: memref<16x128xf32, #tpu.memory_space<vmem>>, %arg2: memref<3x128x256xbf16, #tpu.memory_space<vmem>>, %arg3: memref<3x1x128xf32, #tpu.memory_space<vmem>>, %arg4: memref<16x128xf32, #tpu.memory_space<vmem>>) attributes {dimension_semantics = [#tpu.dimension_semantics<parallel>], iteration_bounds = array<i64: 1>, scalar_prefetch = 0 : i64, scratch_operands = 0 : i64, tpu.core_type = #tpu.core_type<tc>, window_params = [{transform_indices = @transform_0, window_bounds = array<i64: 16, 128>}, {pipeline_mode = #tpu.pipeline_mode<synchronous>, transform_indices = @transform_1, window_bounds = array<i64: 3, 128, 256>}, {pipeline_mode = #tpu.pipeline_mode<synchronous>, transform_indices = @transform_2, window_bounds = array<i64: 3, 1, 128>}, {transform_indices = @transform_3, window_bounds = array<i64: 16, 128>}]} {
    %c0 = arith.constant 0 : index
    %c0_0 = arith.constant 0 : index
    %0 = vector.load %arg1[%c0, %c0_0] : memref<16x128xf32, #tpu.memory_space<vmem>>, vector<16x128xf32>
    %c0_1 = arith.constant 0 : index
    %c0_2 = arith.constant 0 : index
    %c0_3 = arith.constant 0 : index
    %1 = vector.load %arg2[%c0_1, %c0_2, %c0_3] : memref<3x128x256xbf16, #tpu.memory_space<vmem>>, vector<1x128x256xbf16>
    %2 = vector.shape_cast %1 : vector<1x128x256xbf16> to vector<128x256xbf16>
    %c0_4 = arith.constant 0 : index
    %c0_5 = arith.constant 0 : index
    %c0_6 = arith.constant 0 : index
    %3 = vector.load %arg3[%c0_4, %c0_5, %c0_6] : memref<3x1x128xf32, #tpu.memory_space<vmem>>, vector<1x1x128xf32>
    %4 = vector.shape_cast %3 : vector<1x1x128xf32> to vector<1x128xf32>
    %5 = arith.truncf %0 : vector<16x128xf32> to vector<16x128xbf16>
    %cst = arith.constant dense<0.000000e+00> : vector<16x256xf32>
    %6 = tpu.matmul %5, %2, %cst {dimension_numbers = #tpu.dot_dimension_numbers<[1], [0], [0], [1], [0, 0, 1, 1], [], []>} : vector<16x128xbf16>, vector<128x256xbf16>, vector<16x256xf32> -> vector<16x256xf32>
    %7 = vector.extract_strided_slice %6 {offsets = [0, 0], sizes = [16, 128], strides = [1, 1]} : vector<16x256xf32> to vector<16x128xf32>
    %8 = vector.extract_strided_slice %6 {offsets = [0, 128], sizes = [16, 128], strides = [1, 1]} : vector<16x256xf32> to vector<16x128xf32>
    %9 = arith.negf %8 : vector<16x128xf32>
    %10 = math.exp %9 : vector<16x128xf32>
    %cst_7 = arith.constant 1.000000e+00 : f32
    %11 = vector.broadcast %cst_7 : f32 to vector<16x128xf32>
    %12 = arith.addf %11, %10 : vector<16x128xf32>
    %13 = arith.divf %11, %12 : vector<16x128xf32>
    %14 = vector.broadcast %4 : vector<1x128xf32> to vector<16x128xf32>
    %15 = arith.addf %7, %14 : vector<16x128xf32>
    %16 = arith.mulf %0, %15 : vector<16x128xf32>
    %17 = arith.mulf %16, %13 : vector<16x128xf32>
    %18 = arith.addf %17, %0 : vector<16x128xf32>
    %c1 = arith.constant 1 : index
    %c0_8 = arith.constant 0 : index
    %c0_9 = arith.constant 0 : index
    %19 = vector.load %arg2[%c1, %c0_8, %c0_9] : memref<3x128x256xbf16, #tpu.memory_space<vmem>>, vector<1x128x256xbf16>
    %20 = vector.shape_cast %19 : vector<1x128x256xbf16> to vector<128x256xbf16>
    %c1_10 = arith.constant 1 : index
    %c0_11 = arith.constant 0 : index
    %c0_12 = arith.constant 0 : index
    %21 = vector.load %arg3[%c1_10, %c0_11, %c0_12] : memref<3x1x128xf32, #tpu.memory_space<vmem>>, vector<1x1x128xf32>
    %22 = vector.shape_cast %21 : vector<1x1x128xf32> to vector<1x128xf32>
    %23 = arith.truncf %18 : vector<16x128xf32> to vector<16x128xbf16>
    %cst_13 = arith.constant dense<0.000000e+00> : vector<16x256xf32>
    %24 = tpu.matmul %23, %20, %cst_13 {dimension_numbers = #tpu.dot_dimension_numbers<[1], [0], [0], [1], [0, 0, 1, 1], [], []>} : vector<16x128xbf16>, vector<128x256xbf16>, vector<16x256xf32> -> vector<16x256xf32>
    %25 = vector.extract_strided_slice %24 {offsets = [0, 0], sizes = [16, 128], strides = [1, 1]} : vector<16x256xf32> to vector<16x128xf32>
    %26 = vector.extract_strided_slice %24 {offsets = [0, 128], sizes = [16, 128], strides = [1, 1]} : vector<16x256xf32> to vector<16x128xf32>
    %27 = arith.negf %26 : vector<16x128xf32>
    %28 = math.exp %27 : vector<16x128xf32>
    %cst_14 = arith.constant 1.000000e+00 : f32
    %29 = vector.broadcast %cst_14 : f32 to vector<16x128xf32>
    %30 = arith.addf %29, %28 : vector<16x128xf32>
    %31 = arith.divf %29, %30 : vector<16x128xf32>
    %32 = vector.broadcast %22 : vector<1x128xf32> to vector<16x128xf32>
    %33 = arith.addf %25, %32 : vector<16x128xf32>
    %34 = arith.mulf %0, %33 : vector<16x128xf32>
    %35 = arith.mulf %34, %31 : vector<16x128xf32>
    %36 = arith.addf %35, %18 : vector<16x128xf32>
    %c2 = arith.constant 2 : index
    %c0_15 = arith.constant 0 : index
    %c0_16 = arith.constant 0 : index
    %37 = vector.load %arg2[%c2, %c0_15, %c0_16] : memref<3x128x256xbf16, #tpu.memory_space<vmem>>, vector<1x128x256xbf16>
    %38 = vector.shape_cast %37 : vector<1x128x256xbf16> to vector<128x256xbf16>
    %c2_17 = arith.constant 2 : index
    %c0_18 = arith.constant 0 : index
    %c0_19 = arith.constant 0 : index
    %39 = vector.load %arg3[%c2_17, %c0_18, %c0_19] : memref<3x1x128xf32, #tpu.memory_space<vmem>>, vector<1x1x128xf32>
    %40 = vector.shape_cast %39 : vector<1x1x128xf32> to vector<1x128xf32>
    %41 = arith.truncf %36 : vector<16x128xf32> to vector<16x128xbf16>
    %cst_20 = arith.constant dense<0.000000e+00> : vector<16x256xf32>
    %42 = tpu.matmul %41, %38, %cst_20 {dimension_numbers = #tpu.dot_dimension_numbers<[1], [0], [0], [1], [0, 0, 1, 1], [], []>} : vector<16x128xbf16>, vector<128x256xbf16>, vector<16x256xf32> -> vector<16x256xf32>
    %43 = vector.extract_strided_slice %42 {offsets = [0, 0], sizes = [16, 128], strides = [1, 1]} : vector<16x256xf32> to vector<16x128xf32>
    %44 = vector.extract_strided_slice %42 {offsets = [0, 128], sizes = [16, 128], strides = [1, 1]} : vector<16x256xf32> to vector<16x128xf32>
    %45 = arith.negf %44 : vector<16x128xf32>
    %46 = math.exp %45 : vector<16x128xf32>
    %cst_21 = arith.constant 1.000000e+00 : f32
    %47 = vector.broadcast %cst_21 : f32 to vector<16x128xf32>
    %48 = arith.addf %47, %46 : vector<16x128xf32>
    %49 = arith.divf %47, %48 : vector<16x128xf32>
    %50 = vector.broadcast %40 : vector<1x128xf32> to vector<16x128xf32>
    %51 = arith.addf %43, %50 : vector<16x128xf32>
    %52 = arith.mulf %0, %51 : vector<16x128xf32>
    %53 = arith.mulf %52, %49 : vector<16x128xf32>
    %54 = arith.addf %53, %36 : vector<16x128xf32>
    %c0_22 = arith.constant 0 : index
    %c0_23 = arith.constant 0 : index
    %55 = vector.load %arg4[%c0_22, %c0_23] : memref<16x128xf32, #tpu.memory_space<vmem>>, vector<16x128xf32>
    tpu.vector_store %arg4[%c0_22, %c0_23], %54 {strides = array<i32>} : memref<16x128xf32, #tpu.memory_space<vmem>>, vector<16x128xf32>,
    return
  }
  func.func @transform_0(%arg0: i32) -> (i32, i32) {
    %c0_i32 = arith.constant 0 : i32
    %c0_i32_0 = arith.constant 0 : i32
    return %arg0, %c0_i32 : i32, i32
  }
  func.func @transform_1(%arg0: i32) -> (i32, i32, i32) {
    %c0_i32 = arith.constant 0 : i32
    %c0_i32_0 = arith.constant 0 : i32
    %c0_i32_1 = arith.constant 0 : i32
    %c0_i32_2 = arith.constant 0 : i32
    return %c0_i32, %c0_i32_0, %c0_i32_1 : i32, i32, i32
  }
  func.func @transform_2(%arg0: i32) -> (i32, i32, i32) {
    %c0_i32 = arith.constant 0 : i32
    %c0_i32_0 = arith.constant 0 : i32
    %c0_i32_1 = arith.constant 0 : i32
    %c0_i32_2 = arith.constant 0 : i32
    return %c0_i32, %c0_i32_0, %c0_i32_1 : i32, i32, i32
  }
  func.func @transform_3(%arg0: i32) -> (i32, i32) {
    %c0_i32 = arith.constant 0 : i32
    %c0_i32_0 = arith.constant 0 : i32
    return %arg0, %c0_i32 : i32, i32
  }
}

</mosaic_0001>

<bundles_post_ra>
// kernel: tpu_custom_call.1
= control target key start
LH: loop header
LB: loop body
LE: loop exit
PB: predicated region body
PF: predicated region fallthrough
CT: control target
= control target key end

     0   :  { %8 = vsyncpa [#allocation3], 0  ;;  %s898_s0 = inlined_call_operand.hbm [shape: f32[16,128], index: 0, kind: input, shape index: {}]   ;;  %s899_s1 = inlined_call_operand.hbm [shape: bf16[3,128,256], index: 1, kind: input, shape index: {}]   ;;  %s900_s2 = inlined_call_operand.vmem [shape: f32[3,1,128], index: 2, kind: input, shape index: {}]   ;;  %s901_s3 = inlined_call_operand.hbm [shape: f32[16,128], index: 3, kind: output, shape index: {}]  }
   0x1   :  { %9 = vsyncpa [#allocation6], 0 }
   0x2   :  { %10 = vsyncpa [#allocation4], 0  ;;  %s804_s12 = smov [#allocation2]   ;;  %s732_s16 = scalar_lea.hbm %s898_s0, 256 }
   0x3   :  { %s16_s13 = sshll.u32 %s804_s12, 4  ;;  %p733_p0 = scmp.ne.s32.totalorder %s898_s0, %s732_s16  ;;  %s17_s13 = int_to_ptr.vmem [resolvable:$true] %s16_s13 }
   0x4   :  { %p736_p1 = scmp.lt.u32.totalorder %s732_s16, %s898_s0 }
   0x6   :  { %p738_p2 = pnand %p736_p1, %p733_p0 }
   0x8   :  { %741 = shalt.err (!%p738_p2)
}
   0x9   :  { %s742_s21 = scalar_lea.vmem %s17_s13, 256  ;;  %p747_p4 = scmp.lt.s32.totalorder %s17_s13, %s17_s13 }
   0xa   :  { %p743_p3 = scmp.ne.s32.totalorder %s17_s13, %s742_s21  ;;  %p748_p5 = scmp.lt.s32.totalorder %s742_s21, %s742_s21 }
   0xc   :  { %p749_p6 = por %p748_p5, %p747_p4 }
   0xe   :  { %p750_p7 = pnand %p749_p6, %p743_p3 }
  0x10   :  { %753 = shalt.err (!%p750_p7)
}
  0x11   :  { %s805_s22 = smov 128   ;;  %s806_s23 = smov 8  }
  0x12   :  { %22 = dma.hbm_to_vmem [thread:$0]  %s898_s0, 256, %s17_s13, [#allocation3], %s805_s22, %s805_s22, %s806_s23  }
  0x13   :  { %s807_s26 = smov [#allocation5]   ;;  %s754_s30 = scalar_lea.hbm %s899_s1, 6144 }
  0x14   :  { %s28_s27 = sshll.u32 %s807_s26, 4  ;;  %p755_p8 = scmp.ne.s32.totalorder %s899_s1, %s754_s30  ;;  %s29_s27 = int_to_ptr.vmem [resolvable:$true] %s28_s27 }
  0x15   :  { %p758_p9 = scmp.lt.u32.totalorder %s754_s30, %s899_s1 }
  0x17   :  { %p760_p10 = pnand %p758_p9, %p755_p8 }
  0x19   :  { %763 = shalt.err (!%p760_p10)
}
  0x1a   :  { %s764_s8 = scalar_lea.vmem %s29_s27, 6144  ;;  %p769_p12 = scmp.lt.s32.totalorder %s29_s27, %s29_s27 }
  0x1b   :  { %p765_p11 = scmp.ne.s32.totalorder %s29_s27, %s764_s8  ;;  %p770_p13 = scmp.lt.s32.totalorder %s764_s8, %s764_s8 }
  0x1d   :  { %p771_p0 = por %p770_p13, %p769_p12 }
  0x1f   :  { %p772_p1 = pnand %p771_p0, %p765_p11 }
  0x21   :  { %775 = shalt.err (!%p772_p1)
}
  0x22   :  { %34 = dma.hbm_to_vmem [thread:$0]  %s899_s1, 6144, %s29_s27, [#allocation6], %s805_s22, %s805_s22, %s806_s23  }
  0x23   :  { %798 = dma.done.wait [#allocation3], 256  }
  0x24   :  { %799 = vsyncadd [#allocation3], 4294967040 }
  0x25   :  { %800 = dma.done.wait [#allocation6], 6144  }
  0x26   :  { %801 = vsyncadd [#allocation6], 4294961152  ;;  %v808_v0 = vmov 0   ;;  %v636_v1 = vld [vmem:[#allocation5 + $0x4] ss:$8 sps:$4 sm:$0xff]   ;;  %v860_v17 = vld [vmem:[#allocation2] sm:$0xff] }
  0x27   :  { %176 = vmatprep.mubr.bf16.mxu0 %v808_v0  ;;  %345 = vmatprep.mubr.bf16.mxu1 %v808_v0  ;;  %v638_v2 = vld [vmem:[#allocation5] ss:$8 sps:$4 sm:$0xff]   ;;  %v639_v3 = vld [vmem:[#allocation5 + $0x14] ss:$8 sps:$4 sm:$0xff]   ;;  %v641_v4 = vld [vmem:[#allocation5 + $0x10] ss:$8 sps:$4 sm:$0xff]  }
  0x28   :  { %144 = vmatprep.subr.bf16.mxu0 %v636_v1  ;;  %v642_v5 = vld [vmem:[#allocation5 + $0x24] ss:$8 sps:$4 sm:$0xff]   ;;  %v644_v6 = vld [vmem:[#allocation5 + $0x20] ss:$8 sps:$4 sm:$0xff]   ;;  %v645_v7 = vld [vmem:[#allocation5 + $0x34] ss:$8 sps:$4 sm:$0xff]  }
  0x29   :  { %145 = vmatpush1.bf16.msra.mxu0 %v638_v2  ;;  %v647_v8 = vld [vmem:[#allocation5 + $0x30] ss:$8 sps:$4 sm:$0xff]   ;;  %v648_v9 = vld [vmem:[#allocation5 + $0x44] ss:$8 sps:$4 sm:$0xff]   ;;  %v650_v10 = vld [vmem:[#allocation5 + $0x40] ss:$8 sps:$4 sm:$0xff]  }
  0x2a   :  { %146 = vmatprep.subr.bf16.mxu0 %v639_v3  ;;  %v651_v11 = vld [vmem:[#allocation5 + $0x54] ss:$8 sps:$4 sm:$0xff]   ;;  %v653_v12 = vld [vmem:[#allocation5 + $0x50] ss:$8 sps:$4 sm:$0xff]   ;;  %v654_v13 = vld [vmem:[#allocation5 + $0x64] ss:$8 sps:$4 sm:$0xff]  }
  0x2b   :  { %v656_v14 = vld [vmem:[#allocation5 + $0x60] ss:$8 sps:$4 sm:$0xff]   ;;  %v657_v15 = vld [vmem:[#allocation5 + $0x74] ss:$8 sps:$4 sm:$0xff]   ;;  %v659_v16 = vld [vmem:[#allocation5 + $0x70] ss:$8 sps:$4 sm:$0xff]  }
  0x2c   :  { %v862_v18 = vld [vmem:[#allocation2 + $0x8] sm:$0xff]  ;;  %v660_v20 = vld [vmem:[#allocation5 + $0x84] ss:$8 sps:$4 sm:$0xff]   ;;  %v662_v21 = vld [vmem:[#allocation5 + $0x80] ss:$8 sps:$4 sm:$0xff]   ;;  %s809_s15 = smov [#allocation7]  }
  0x2d   :  { %147 = vmatpush1.bf16.msra.mxu0 %v641_v4  ;;  %v63_v19 = vpack.c.bf16 %v862_v18, %v860_v17  ;;  %313 = vmatprep.subr.bf16.mxu1 %v660_v20  ;;  %v663_v22 = vld [vmem:[#allocation5 + $0x94] ss:$8 sps:$4 sm:$0xff]   ;;  %v665_v23 = vld [vmem:[#allocation5 + $0x90] ss:$8 sps:$4 sm:$0xff]   ;;  %v666_v24 = vld [vmem:[#allocation5 + $0xa4] ss:$8 sps:$4 sm:$0xff]  }
  0x2e   :  { %148 = vmatprep.subr.bf16.mxu0 %v642_v5  ;;  %314 = vmatpush1.bf16.msra.mxu1 %v662_v21  ;;  %v668_v25 = vld [vmem:[#allocation5 + $0xa0] ss:$8 sps:$4 sm:$0xff]   ;;  %v669_v26 = vld [vmem:[#allocation5 + $0xb4] ss:$8 sps:$4 sm:$0xff]   ;;  %v671_v27 = vld [vmem:[#allocation5 + $0xb0] ss:$8 sps:$4 sm:$0xff]  }
  0x2f   :  { %315 = vmatprep.subr.bf16.mxu1 %v663_v22  ;;  %v672_v28 = vld [vmem:[#allocation5 + $0xc4] ss:$8 sps:$4 sm:$0xff]   ;;  %v674_v29 = vld [vmem:[#allocation5 + $0xc0] ss:$8 sps:$4 sm:$0xff]   ;;  %v675_v30 = vld [vmem:[#allocation5 + $0xd4] ss:$8 sps:$4 sm:$0xff]  }
  0x30   :  { %v677_v31 = vld [vmem:[#allocation5 + $0xd0] ss:$8 sps:$4 sm:$0xff]   ;;  %v678_v32 = vld [vmem:[#allocation5 + $0xe4] ss:$8 sps:$4 sm:$0xff]   ;;  %v680_v33 = vld [vmem:[#allocation5 + $0xe0] ss:$8 sps:$4 sm:$0xff]  }
  0x31   :  { %149 = vmatpush1.bf16.msra.mxu0 %v644_v6  ;;  %v681_v34 = vld [vmem:[#allocation5 + $0xf4] ss:$8 sps:$4 sm:$0xff]   ;;  %v683_v35 = vld [vmem:[#allocation5 + $0xf0] ss:$8 sps:$4 sm:$0xff]   ;;  %v686_v58 = vld [vmem:[#allocation5 + $0x104] ss:$8 sps:$4 sm:$0xff]  }
  0x32   :  { %150 = vmatprep.subr.bf16.mxu0 %v645_v7  ;;  %316 = vmatpush1.bf16.msra.mxu1 %v665_v23  ;;  %v589_v46 = vld [vmem:[%s900_s2] ss:$0 sm:$0xff]  ;;  %v684_v59 = vld [vmem:[#allocation5 + $0x100] ss:$8 sps:$4 sm:$0xff]   ;;  %v689_v60 = vld [vmem:[#allocation5 + $0x114] ss:$8 sps:$4 sm:$0xff]  }
  0x33   :  { %317 = vmatprep.subr.bf16.mxu1 %v666_v24  ;;  %v687_v61 = vld [vmem:[#allocation5 + $0x110] ss:$8 sps:$4 sm:$0xff]   ;;  %v692_v62 = vld [vmem:[#allocation5 + $0x124] ss:$8 sps:$4 sm:$0xff]   ;;  %v690_v63 = vld [vmem:[#allocation5 + $0x120] ss:$8 sps:$4 sm:$0xff]  }
  0x34   :  { %v693_v1 = vld [vmem:[#allocation5 + $0x130] ss:$8 sps:$4 sm:$0xff]   ;;  %v698_v2 = vld [vmem:[#allocation5 + $0x144] ss:$8 sps:$4 sm:$0xff]   ;;  %v696_v3 = vld [vmem:[#allocation5 + $0x140] ss:$8 sps:$4 sm:$0xff]  }
  0x35   :  { %151 = vmatpush1.bf16.msra.mxu0 %v647_v8  ;;  %v701_v4 = vld [vmem:[#allocation5 + $0x154] ss:$8 sps:$4 sm:$0xff]   ;;  %v699_v5 = vld [vmem:[#allocation5 + $0x150] ss:$8 sps:$4 sm:$0xff]   ;;  %v704_v6 = vld [vmem:[#allocation5 + $0x164] ss:$8 sps:$4 sm:$0xff]  }
  0x36   :  { %152 = vmatprep.subr.bf16.mxu0 %v648_v9  ;;  %318 = vmatpush1.bf16.msra.mxu1 %v668_v25  ;;  %v702_v7 = vld [vmem:[#allocation5 + $0x160] ss:$8 sps:$4 sm:$0xff]   ;;  %v707_v8 = vld [vmem:[#allocation5 + $0x174] ss:$8 sps:$4 sm:$0xff]   ;;  %v705_v9 = vld [vmem:[#allocation5 + $0x170] ss:$8 sps:$4 sm:$0xff]  }
  0x37   :  { %319 = vmatprep.subr.bf16.mxu1 %v669_v26  ;;  %v609_v22 = vld [vmem:[%s900_s2 + $0x1] ss:$0 sm:$0xff]  ;;  %s558_s16 = sshll.u32 %s809_s15, 4  ;;  %s559_s16 = int_to_ptr.vmem [resolvable:$true] %s558_s16 }
  0x38   :  { %s776_s17 = scalar_lea.vmem %s559_s16, 256  ;;  %p781_p3 = scmp.lt.s32.totalorder %s559_s16, %s559_s16 }
  0x39   :  { %153 = vmatpush1.bf16.msra.mxu0 %v650_v10  ;;  %p777_p2 = scmp.ne.s32.totalorder %s559_s16, %s776_s17  ;;  %p782_p4 = scmp.lt.s32.totalorder %s776_s17, %s776_s17 }
  0x3a   :  { %154 = vmatprep.subr.bf16.mxu0 %v651_v11  ;;  %320 = vmatpush1.bf16.msra.mxu1 %v671_v27 }
  0x3b   :  { %321 = vmatprep.subr.bf16.mxu1 %v672_v28  ;;  %p783_p5 = por %p782_p4, %p781_p3 }
  0x3d   :  { %155 = vmatpush1.bf16.msra.mxu0 %v653_v12  ;;  %p784_p6 = pnand %p783_p5, %p777_p2 }
  0x3e   :  { %156 = vmatprep.subr.bf16.mxu0 %v654_v13  ;;  %322 = vmatpush1.bf16.msra.mxu1 %v674_v29 }
  0x3f   :  { %323 = vmatprep.subr.bf16.mxu1 %v675_v30 }
  0x41   :  { %157 = vmatpush1.bf16.msra.mxu0 %v656_v14 }
  0x42   :  { %158 = vmatprep.subr.bf16.mxu0 %v657_v15  ;;  %324 = vmatpush1.bf16.msra.mxu1 %v677_v31 }
  0x43   :  { %325 = vmatprep.subr.bf16.mxu1 %v678_v32 }
  0x45   :  { %159 = vmatpush1.bf16.msra.mxu0 %v659_v16 }
  0x46   :  { %326 = vmatpush1.bf16.msra.mxu1 %v680_v33  ;;  %482 = vmatprep.subr.bf16.mxu0 %v686_v58 }
  0x47   :  { %327 = vmatprep.subr.bf16.mxu1 %v681_v34 }
  0x48   :  { %177 = vmatmul.mubr.bf16.vlgmr.msra.gmra.mrb[0].mxu0 %v63_v19 }
  0x49   :  { %514 = vmatprep.mubr.bf16.mxu0 %v808_v0  ;;  %483 = vmatpush1.bf16.msra.mxu0 %v684_v59  ;;  %v695_v0 = vld [vmem:[#allocation5 + $0x134] ss:$8 sps:$4 sm:$0xff]  }
  0x4a   :  { %328 = vmatpush1.bf16.msra.mxu1 %v683_v35  ;;  %484 = vmatprep.subr.bf16.mxu0 %v689_v60 }
  0x4d   :  { %485 = vmatpush1.bf16.msra.mxu0 %v687_v61 }
  0x4e   :  { %486 = vmatprep.subr.bf16.mxu0 %v692_v62 }
  0x51   :  { %487 = vmatpush1.bf16.msra.mxu0 %v690_v63 }
  0x52   :  { %488 = vmatprep.subr.bf16.mxu0 %v695_v0 }
  0x55   :  { %489 = vmatpush1.bf16.msra.mxu0 %v693_v1 }
  0x56   :  { %490 = vmatprep.subr.bf16.mxu0 %v698_v2 }
  0x59   :  { %491 = vmatpush1.bf16.msra.mxu0 %v696_v3 }
  0x5a   :  { %492 = vmatprep.subr.bf16.mxu0 %v701_v4 }
  0x5d   :  { %493 = vmatpush1.bf16.msra.mxu0 %v699_v5 }
  0x5e   :  { %494 = vmatprep.subr.bf16.mxu0 %v704_v6 }
  0x61   :  { %495 = vmatpush1.bf16.msra.mxu0 %v702_v7 }
  0x62   :  { %496 = vmatprep.subr.bf16.mxu0 %v707_v8 }
  0x65   :  { %497 = vmatpush1.bf16.msra.mxu0 %v705_v9 }
 0x11b   :  { %v178_v36 = vpop.f32.mrb[0].mxu0 }
 0x11c   :  { %v180_v37 = vpop.f32.mrb[1].mxu0  ;;  %v205_v47 = vadd.f32 %v589_v46, %v178_v36 }
 0x11d   :  { %v587_v38 = vmul.f32 -1.442695, %v180_v37  ;;  %v182_v39 = vpop.f32.mrb[2].mxu0 }
 0x11e   :  { %v184_v40 = vpop.f32.mrb[3].mxu0  ;;  %v206_v48 = vadd.f32 %v589_v46, %v182_v39  ;;  %v207_v49 = vmul.f32 %v205_v47, %v860_v17 }
 0x11f   :  { %708 = vpow2.f32 %v587_v38  ;;  %v588_v41 = vmul.f32 -1.442695, %v184_v40 }
 0x120   :  { %v208_v51 = vmul.f32 %v206_v48, %v862_v18 }
 0x121   :  { %710 = vpow2.f32 %v588_v41 }
 0x129   :  { %v709_v42 = vpop.eup %708 }
 0x12a   :  { %v193_v43 = vadd.f32 1.0, %v709_v42 }
 0x12b   :  { %v711_v44 = vpop.eup %710 }
 0x12c   :  { %712 = vrcp.f32 %v193_v43  ;;  %v194_v45 = vadd.f32 1.0, %v711_v44  ;;  %v629_v44 = vld [vmem:[%s900_s2 + $0x2] ss:$0 sm:$0xff] }
 0x12e   :  { %714 = vrcp.f32 %v194_v45 }
 0x136   :  { %v713_v50 = vpop.eup %712 }
 0x137   :  { %v209_v52 = vmul.f32 %v713_v50, %v207_v49 }
 0x138   :  { %v715_v53 = vpop.eup %714 }
 0x139   :  { %v210_v54 = vmul.f32 %v715_v53, %v208_v51  ;;  %v211_v55 = vadd.f32 %v209_v52, %v860_v17 }
 0x13b   :  { %v212_v56 = vadd.f32 %v210_v54, %v862_v18 }
 0x13d   :  { %v232_v57 = vpack.c.bf16 %v212_v56, %v211_v55 }
 0x13f   :  { %346 = vmatmul.mubr.bf16.vlgmr.msra.gmra.mrb[0].mxu1 %v232_v57 }
 0x212   :  { %v347_v10 = vpop.f32.mrb[0].mxu1 }
 0x213   :  { %v349_v11 = vpop.f32.mrb[1].mxu1  ;;  %v374_v23 = vadd.f32 %v609_v22, %v347_v10 }
 0x214   :  { %v607_v12 = vmul.f32 -1.442695, %v349_v11  ;;  %v351_v13 = vpop.f32.mrb[2].mxu1 }
 0x215   :  { %v353_v14 = vpop.f32.mrb[3].mxu1  ;;  %v375_v24 = vadd.f32 %v609_v22, %v351_v13  ;;  %v376_v25 = vmul.f32 %v374_v23, %v860_v17 }
 0x216   :  { %716 = vpow2.f32 %v607_v12  ;;  %v608_v15 = vmul.f32 -1.442695, %v353_v14 }
 0x217   :  { %v377_v27 = vmul.f32 %v375_v24, %v862_v18 }
 0x218   :  { %718 = vpow2.f32 %v608_v15 }
 0x220   :  { %v717_v16 = vpop.eup %716 }
 0x221   :  { %v362_v19 = vadd.f32 1.0, %v717_v16 }
 0x222   :  { %v719_v20 = vpop.eup %718 }
 0x223   :  { %720 = vrcp.f32 %v362_v19  ;;  %v363_v21 = vadd.f32 1.0, %v719_v20 }
 0x225   :  { %722 = vrcp.f32 %v363_v21 }
 0x22d   :  { %v721_v26 = vpop.eup %720 }
 0x22e   :  { %v378_v28 = vmul.f32 %v721_v26, %v376_v25 }
 0x22f   :  { %v723_v29 = vpop.eup %722 }
 0x230   :  { %v379_v30 = vmul.f32 %v723_v29, %v377_v27  ;;  %v380_v31 = vadd.f32 %v378_v28, %v211_v55 }
 0x232   :  { %v381_v32 = vadd.f32 %v379_v30, %v212_v56 }
 0x234   :  { %v401_v33 = vpack.c.bf16 %v381_v32, %v380_v31 }
 0x236   :  { %515 = vmatmul.mubr.bf16.vlgmr.msra.gmra.mrb[4].mxu0 %v401_v33 }
 0x309   :  { %v516_v34 = vpop.f32.mrb[4].mxu0 }
 0x30a   :  { %v518_v35 = vpop.f32.mrb[5].mxu0  ;;  %v543_v45 = vadd.f32 %v629_v44, %v516_v34 }
 0x30b   :  { %v627_v36 = vmul.f32 -1.442695, %v518_v35  ;;  %v520_v37 = vpop.f32.mrb[6].mxu0 }
 0x30c   :  { %v522_v38 = vpop.f32.mrb[7].mxu0  ;;  %v544_v46 = vadd.f32 %v629_v44, %v520_v37  ;;  %v545_v47 = vmul.f32 %v543_v45, %v860_v17 }
 0x30d   :  { %724 = vpow2.f32 %v627_v36  ;;  %v628_v39 = vmul.f32 -1.442695, %v522_v38 }
 0x30e   :  { %v546_v49 = vmul.f32 %v544_v46, %v862_v18 }
 0x30f   :  { %726 = vpow2.f32 %v628_v39 }
 0x317   :  { %v725_v40 = vpop.eup %724 }
 0x318   :  { %v531_v41 = vadd.f32 1.0, %v725_v40 }
 0x319   :  { %v727_v42 = vpop.eup %726 }
 0x31a   :  { %728 = vrcp.f32 %v531_v41  ;;  %v532_v43 = vadd.f32 1.0, %v727_v42 }
 0x31c   :  { %730 = vrcp.f32 %v532_v43 }
 0x324   :  { %v729_v48 = vpop.eup %728 }
 0x325   :  { %v547_v50 = vmul.f32 %v729_v48, %v545_v47 }
 0x326   :  { %v731_v51 = vpop.eup %730 }
 0x327   :  { %v548_v52 = vmul.f32 %v731_v51, %v546_v49  ;;  %v549_v53 = vadd.f32 %v547_v50, %v380_v31 }
 0x329   :  { %v550_v54 = vadd.f32 %v548_v52, %v381_v32  ;;  %551 = vst [vmem:[#allocation7] sm:$0xff] %v549_v53 }
 0x32b   :  { %552 = vst [vmem:[#allocation7 + $0x8] sm:$0xff] %v550_v54 }
 0x32c   :  { %787 = shalt.err (!%p784_p6)
}
 0x32d   :  { %s788_s19 = scalar_lea.hbm %s901_s3, 256 }
 0x32e   :  { %p789_p7 = scmp.ne.s32.totalorder %s901_s3, %s788_s19  ;;  %p792_p8 = scmp.lt.u32.totalorder %s788_s19, %s901_s3 }
 0x330   :  { %p794_p9 = pnand %p792_p8, %p789_p7 }
 0x332   :  { %797 = shalt.err (!%p794_p9)
}
 0x333   :  { %564 = dma.vmem_to_hbm [thread:$0]  %s559_s16, 256, %s901_s3, [#allocation4], %s805_s22, %s805_s22, %s806_s23  }
 0x334   :  { %802 = dma.done.wait [#allocation4], 256  }
 0x335   :  { %803 = vsyncadd [#allocation4], 4294967040 }
 0x336   :  { %568 = vsyncpa [#allocation3], 1 }
 0x337   :  { %569 = vsyncpa [#allocation6], 1 }
 0x338   :  { %570 = vsyncpa [#allocation4], 1 }

</bundles_post_ra>
